<compile_context>
chip_gen: v6e
topology: v6e:2x2x1
jax: 0.10.0
libtpu: 0.0.40
codegen_flags: <defaults>
</compile_context>

<pallas_src>
import functools

import jax
import jax.numpy as jnp
from jax.experimental import pallas as pl
from jax.experimental.pallas import tpu as pltpu


def _round_up(n, m):
    return ((n + m - 1) // m) * m


# ----------------------------- kernel bodies --------------------------------
def _fold_kernel(x_ref, w_ref, c_ref, o_ref, *, mxu_dtype):
    """out = relu(x @ W' + c) + x, with W' = v.T@u.T (FiLM scale folded in)."""
    pre = jnp.dot(x_ref[...].astype(mxu_dtype), w_ref[...],
                  preferred_element_type=jnp.float32)
    acts = jnp.maximum(pre + c_ref[...], 0.0)
    # Re-read x for the residual instead of keeping an f32 copy live across
    # the dot (reduces vreg pressure on large batch tiles).
    o_ref[...] = (acts + x_ref[...].astype(jnp.float32)).astype(o_ref.dtype)


def _lowrank_kernel(x_ref, vt_ref, ut_ref, c_ref, o_ref, *, mxu_dtype):
    """out = relu((x @ v.T) @ (u.T * scale) + c) + x  (low-rank kept intact)."""
    t = jnp.dot(x_ref[...].astype(mxu_dtype), vt_ref[...],
                preferred_element_type=jnp.float32)              # (TM, rp)
    pre = jnp.dot(t.astype(mxu_dtype), ut_ref[...],
                  preferred_element_type=jnp.float32)            # (TM, Fp)
    acts = jnp.maximum(pre + c_ref[...], 0.0)
    o_ref[...] = (acts + x_ref[...].astype(jnp.float32)).astype(o_ref.dtype)


# ------------------------- constant (per-weights) prep -----------------------
def prepare_lrlinear_params(u, v, bias, mode_scale=None, mode_shift=None,
                            mode=None, *, mxu_dtype=jnp.bfloat16,
                            force_path=None):
    """Hoisted weight prep: do once per (weights, mode), reuse across calls.

    Folds FiLM scale into weight columns and bias into the shift, casts MXU
    operands (bf16 default; f32 accumulation stays in the kernel), zero-pads
    feature/rank axes to lane-dense multiples of 128 (no-op when already so).
    """
    outf, mid = u.shape
    midv, inf = v.shape
    assert midv == mid
    assert outf == inf, "init='id' residual requires outf == inf"
    F = int(outf)
    Fp = _round_up(F, 128)
    rp = _round_up(int(mid), 128)

    u32 = u.astype(jnp.float32)
    v32 = v.astype(jnp.float32)
    b32 = bias.astype(jnp.float32)

    if mode is not None:
        scale = mode_scale[mode].astype(jnp.float32)
        shift = mode_shift[mode].astype(jnp.float32)
        c = b32 * scale + shift
    else:
        scale = None
        c = b32
    c_p = jnp.pad(c, (0, Fp - F)).reshape(1, Fp).astype(jnp.float32)

    # Dense fold only while the Fp x Fp weight is no bigger than the low-rank
    # pair (2 * Fp * rp); beyond that keep the low-rank structure.
    path = force_path if force_path is not None else (
        "fold" if Fp <= 2 * rp else "lowrank")

    if path == "fold":
        W = v32.T @ u32.T                                   # (inf, outf)
        if scale is not None:
            W = W * scale[None, :]
        W_p = jnp.pad(W, ((0, Fp - F), (0, Fp - F))).astype(mxu_dtype)
        weights = (W_p,)
    elif path == "lowrank":
        vT = v32.T                                          # (inf, mid)
        uT = u32.T                                          # (mid, outf)
        if scale is not None:
            uT = uT * scale[None, :]
        # Zero pads are load-bearing: padded x lanes hit zero rows of vT, and
        # padded rank columns hit zero rows of uT.
        vT_p = jnp.pad(vT, ((0, Fp - F), (0, rp - mid))).astype(mxu_dtype)
        uT_p = jnp.pad(uT, ((0, rp - mid), (0, Fp - F))).astype(mxu_dtype)
        weights = (vT_p, uT_p)
    else:
        raise ValueError(f"unknown path {path!r}")

    return dict(path=path, weights=weights, c=c_p, F=F, Fp=Fp, rp=rp,
                mxu_dtype=mxu_dtype)


# --------------------------------- apply -------------------------------------
_VMEM_BUDGET = 48 * 2**20     # conservative: fits v7x 64 MiB/TC with headroom


def _tile_vmem_bytes(TM, Fp, rp, path, x_bytes, w_bytes, out_bytes,
                     x_bufs, w_bufs):
    total = x_bufs * TM * Fp * x_bytes            # x tiles (pipelined)
    total += 2 * TM * Fp * out_bytes              # out tiles (double buffered)
    if path == "fold":
        total += w_bufs * Fp * Fp * w_bytes       # resident W'
    else:
        total += w_bufs * 2 * Fp * rp * w_bytes   # resident vT + uT
    total += w_bufs * Fp * 4                      # resident c
    return total


def lrlinear_apply(params, x, *, block_b=512, out_dtype=None, x_buffer_count=2):
    """x: (B, F). Only the pallas_call (plus feature pad if F % 128 != 0)."""
    B, inf = x.shape
    F, Fp, rp = params["F"], params["Fp"], params["rp"]
    path, weights, c_p = params["path"], params["weights"], params["c"]
    mxu_dtype = params["mxu_dtype"]
    assert inf == F, f"Input wrong dim ({x.shape}, {F})"
    out_dtype = x.dtype if out_dtype is None else out_dtype

    x_bytes = jnp.dtype(x.dtype).itemsize
    w_bytes = jnp.dtype(mxu_dtype).itemsize
    o_bytes = jnp.dtype(out_dtype).itemsize

    # Lane-dense K/output padding; a no-op at realistic (multiple-of-128) F.
    x_in = x if Fp == F else jnp.pad(x, ((0, 0), (0, Fp - F)))

    # Batch tile: large (amortizes the ~0.35us/step overhead, fills the MXU M
    # dim), multiple of 8, shrunk to fit the VMEM budget (v7x: 64 MiB/TC).
    # For large B this still yields >= 2 grid steps so ("parallel",) can shard
    # across both v7x TensorCores; no batch padding — ragged last tile is
    # handled by Pallas (OOB reads are row-independent, OOB writes dropped).
    TM = _round_up(min(block_b, B), 8)
    while TM > 8 and _tile_vmem_bytes(TM, Fp, rp, path, x_bytes, w_bytes,
                                      o_bytes, max(2, x_buffer_count),
                                      2) > _VMEM_BUDGET:
        TM = _round_up(TM // 2, 8)
    grid = (pl.cdiv(B, TM),)

    footprint = _tile_vmem_bytes(TM, Fp, rp, path, x_bytes, w_bytes, o_bytes,
                                 max(2, x_buffer_count), 2)
    vmem_limit = int(min(64 * 2**20, max(32 * 2**20, int(1.3 * footprint))))

    if path == "fold":
        flops = 2 * B * Fp * Fp
        weight_bytes = Fp * Fp * w_bytes
        kernel = functools.partial(_fold_kernel, mxu_dtype=mxu_dtype)
    else:
        flops = 4 * B * Fp * rp
        weight_bytes = 2 * Fp * rp * w_bytes
        kernel = functools.partial(_lowrank_kernel, mxu_dtype=mxu_dtype)

    cost = pl.CostEstimate(
        flops=int(flops), transcendentals=0,
        bytes_accessed=int(B * Fp * x_bytes + weight_bytes + Fp * 4
                           + B * Fp * o_bytes))

    def build(single_buffer_resident):
        def resident_spec(shape):
            idx = lambda i: (0,) * len(shape)
            if single_buffer_resident:
                # Constant index_map -> never re-fetched; one buffer is enough.
                return pl.BlockSpec(shape, idx, pipeline_mode=pl.Buffered(1))
            return pl.BlockSpec(shape, idx)

        x_kwargs = {}
        if x_buffer_count != 2:
            # Deeper prefetch of x tiles (useful on v5e if DMA waits are exposed).
            x_kwargs["pipeline_mode"] = pl.Buffered(x_buffer_count)
        x_spec = pl.BlockSpec((TM, Fp), lambda i: (i, 0), **x_kwargs)

        w_specs = [resident_spec(w.shape) for w in weights]
        in_specs = [x_spec] + w_specs + [resident_spec((1, Fp))]

        return pl.pallas_call(
            kernel,
            out_shape=jax.ShapeDtypeStruct((B, Fp), out_dtype),
            grid_spec=pltpu.PrefetchScalarGridSpec(
                num_scalar_prefetch=0,
                grid=grid,
                in_specs=in_specs,
                out_specs=pl.BlockSpec((TM, Fp), lambda i: (i, 0)),
            ),
            compiler_params=pltpu.CompilerParams(
                dimension_semantics=("parallel",),      # megacore-shardable
                vmem_limit_bytes=vmem_limit),
            cost_estimate=cost,
        )

    args = (x_in,) + tuple(weights) + (c_p,)
    try:
        out = build(single_buffer_resident=True)(*args)
    except Exception:
        # pl.Buffered(1) not supported on this jax/libtpu -> default buffering.
        out = build(single_buffer_resident=False)(*args)

    if Fp != F:                      # only for non-128-multiple F (demo sizes)
        out = out[:, :F]
    return out


def lrlinear_forward(x, u, v, bias, mode_scale=None, mode_shift=None, mode=None,
                     *, block_b=512, mxu_dtype=jnp.bfloat16, out_dtype=None,
                     force_path=None, x_buffer_count=2):
    """Convenience wrapper: prep + apply. Prefer calling prepare_* once and
    reusing the params when the same weights/mode are applied repeatedly."""
    params = prepare_lrlinear_params(u, v, bias, mode_scale, mode_shift, mode,
                                     mxu_dtype=mxu_dtype, force_path=force_path)
    return lrlinear_apply(params, x, block_b=block_b, out_dtype=out_dtype,
                          x_buffer_count=x_buffer_count)


# ------------------------------- reference -----------------------------------
def lrlinear_reference(x, u, v, bias, mode_scale=None, mode_shift=None,
                       mode=None):
    pre = (u @ (v @ x.T)).T + bias
    if mode is not None:
        pre = pre * mode_scale[mode] + mode_shift[mode]
    return jnp.maximum(pre, 0.0) + x          # init == 'id'


# --------------------------------- demo ---------------------------------------
if __name__ == "__main__":
    # Module config (synthetic, deterministic init — not a checkpoint load).
    inf, outf, rank, n_modes = 32, 32, 16, 3
    mid = min(rank, inf)
    B = 45              # non-multiple-of-8 batch exercises the ragged-tile path
    mode = 1

    key = jax.random.PRNGKey(0)
    k_u, k_v, k_x, k_sc, k_sh = jax.random.split(key, 5)

    # init='id' in PyTorch uses u=zeros; use small random u so the low-rank
    # path actually contributes (still deterministic).
    u = 0.1 * jax.random.normal(k_u, (outf, mid), jnp.float32)
    v = jax.random.normal(k_v, (mid, inf), jnp.float32)
    bias = 0.01 * jnp.ones((outf,), jnp.float32)
    mode_scale = 1.0 + 0.05 * jax.random.normal(k_sc, (n_modes, outf), jnp.float32)
    mode_shift = 0.05 * jax.random.normal(k_sh, (n_modes, outf), jnp.float32)
    x = jax.random.normal(k_x, (B, inf), jnp.float32)

    ref = lrlinear_reference(x, u, v, bias, mode_scale, mode_shift, mode)

    # 1) Folded path, f32 MXU operands, single 48-row batch tile (1 grid step,
    #    no batch pad / no out[:B] slice).
    out_f32 = lrlinear_forward(x, u, v, bias, mode_scale, mode_shift, mode,
                               mxu_dtype=jnp.float32)
    out_f32 = jax.block_until_ready(out_f32)
    assert out_f32.shape == (B, outf) and out_f32.dtype == x.dtype
    assert jnp.allclose(out_f32, ref, atol=1e-4, rtol=1e-4), "f32 mismatch"

    # 2) Default bf16 MXU operands (valid on v5e/v6e/v7x; accumulation stays
    #    f32). Checked against a bf16-operand reference with the same folding
    #    (tight tol), plus a sanity check vs the true f32 reference.
    params_bf16 = prepare_lrlinear_params(u, v, bias, mode_scale, mode_shift,
                                          mode)           # hoisted weight prep
    out_bf = jax.block_until_ready(lrlinear_apply(params_bf16, x))
    W_fold = (v.T @ u.T) * mode_scale[mode][None, :]
    c_fold = bias * mode_scale[mode] + mode_shift[mode]
    pre_bf = jnp.dot(x.astype(jnp.bfloat16), W_fold.astype(jnp.bfloat16),
                     preferred_element_type=jnp.float32) + c_fold
    ref_bf = jnp.maximum(pre_bf, 0.0) + x
    assert jnp.allclose(out_bf, ref_bf, atol=5e-3, rtol=5e-3), "bf16 mismatch vs bf16 ref"
    assert jnp.allclose(out_bf, ref, atol=1e-1, rtol=2e-2), "bf16 drifted vs f32 ref"

    # 3) Low-rank (two-dot) path forced at small shape; block_b=16 gives a
    #    3-step grid with a ragged last tile (rows 32..47 over B=45).
    out_lr = lrlinear_forward(x, u, v, bias, mode_scale, mode_shift, mode,
                              mxu_dtype=jnp.float32, force_path="lowrank",
                              block_b=16)
    out_lr = jax.block_until_ready(out_lr)
    assert jnp.allclose(out_lr, ref, atol=1e-4, rtol=1e-4), "low-rank mismatch"

    # 4) No-mode path with bf16 output dtype (halves output HBM traffic).
    ref_nm = lrlinear_reference(x, u, v, bias)
    out_nm = lrlinear_forward(x, u, v, bias, mxu_dtype=jnp.float32,
                              out_dtype=jnp.bfloat16)
    out_nm = jax.block_until_ready(out_nm)
    assert out_nm.dtype == jnp.bfloat16
    assert jnp.allclose(out_nm.astype(jnp.float32), ref_nm,
                        atol=5e-2, rtol=2e-2), "no-mode/bf16-out mismatch"

    print("KERNEL_OK")
</pallas_src>

<mosaic_0001>
module attributes {stable_mosaic.version = 11 : i64} {
  func.func @_fold_kernel(%arg0: i32, %arg1: memref<48x128xf32, #tpu.memory_space<vmem>>, %arg2: memref<128x128xf32, #tpu.memory_space<vmem>>, %arg3: memref<1x128xf32, #tpu.memory_space<vmem>>, %arg4: memref<48x128xf32, #tpu.memory_space<vmem>>) attributes {dimension_semantics = [#tpu.dimension_semantics<parallel>], iteration_bounds = array<i64: 1>, scalar_prefetch = 0 : i64, scratch_operands = 0 : i64, tpu.core_type = #tpu.core_type<tc>, window_params = [{transform_indices = @transform_0, window_bounds = array<i64: 48, 128>}, {pipeline_mode = #tpu.pipeline_mode<synchronous>, transform_indices = @transform_1, window_bounds = array<i64: 128, 128>}, {pipeline_mode = #tpu.pipeline_mode<synchronous>, transform_indices = @transform_2, window_bounds = array<i64: 1, 128>}, {transform_indices = @transform_3, window_bounds = array<i64: 48, 128>}]} {
    %c0 = arith.constant 0 : index
    %c0_0 = arith.constant 0 : index
    %0 = vector.load %arg1[%c0, %c0_0] : memref<48x128xf32, #tpu.memory_space<vmem>>, vector<48x128xf32>
    %c0_1 = arith.constant 0 : index
    %c0_2 = arith.constant 0 : index
    %1 = vector.load %arg2[%c0_1, %c0_2] : memref<128x128xf32, #tpu.memory_space<vmem>>, vector<128x128xf32>
    %cst = arith.constant dense<0.000000e+00> : vector<48x128xf32>
    %2 = tpu.matmul %0, %1, %cst {dimension_numbers = #tpu.dot_dimension_numbers<[1], [0], [0], [1], [0, 0, 1, 1], [], []>} : vector<48x128xf32>, vector<128x128xf32>, vector<48x128xf32> -> vector<48x128xf32>
    %c0_3 = arith.constant 0 : index
    %c0_4 = arith.constant 0 : index
    %3 = vector.load %arg3[%c0_3, %c0_4] : memref<1x128xf32, #tpu.memory_space<vmem>>, vector<1x128xf32>
    %4 = vector.broadcast %3 : vector<1x128xf32> to vector<48x128xf32>
    %5 = arith.addf %2, %4 : vector<48x128xf32>
    %cst_5 = arith.constant 0.000000e+00 : f32
    %6 = vector.broadcast %cst_5 : f32 to vector<48x128xf32>
    %7 = arith.maximumf %5, %6 : vector<48x128xf32>
    %c0_6 = arith.constant 0 : index
    %c0_7 = arith.constant 0 : index
    %8 = vector.load %arg1[%c0_6, %c0_7] : memref<48x128xf32, #tpu.memory_space<vmem>>, vector<48x128xf32>
    %9 = arith.addf %7, %8 : vector<48x128xf32>
    %c0_8 = arith.constant 0 : index
    %c0_9 = arith.constant 0 : index
    %10 = vector.load %arg4[%c0_8, %c0_9] : memref<48x128xf32, #tpu.memory_space<vmem>>, vector<48x128xf32>
    tpu.vector_store %arg4[%c0_8, %c0_9], %9 {strides = array<i32>} : memref<48x128xf32, #tpu.memory_space<vmem>>, vector<48x128xf32>,
    return
  }
  func.func @transform_0(%arg0: i32) -> (i32, i32) {
    %c0_i32 = arith.constant 0 : i32
    %c0_i32_0 = arith.constant 0 : i32
    return %arg0, %c0_i32 : i32, i32
  }
  func.func @transform_1(%arg0: i32) -> (i32, i32) {
    %c0_i32 = arith.constant 0 : i32
    %c0_i32_0 = arith.constant 0 : i32
    %c0_i32_1 = arith.constant 0 : i32
    return %c0_i32, %c0_i32_0 : i32, i32
  }
  func.func @transform_2(%arg0: i32) -> (i32, i32) {
    %c0_i32 = arith.constant 0 : i32
    %c0_i32_0 = arith.constant 0 : i32
    %c0_i32_1 = arith.constant 0 : i32
    return %c0_i32, %c0_i32_0 : i32, i32
  }
  func.func @transform_3(%arg0: i32) -> (i32, i32) {
    %c0_i32 = arith.constant 0 : i32
    %c0_i32_0 = arith.constant 0 : i32
    return %arg0, %c0_i32 : i32, i32
  }
}

module attributes {stable_mosaic.version = 11 : i64} {
  func.func @_fold_kernel(%arg0: i32, %arg1: memref<48x128xf32, #tpu.memory_space<vmem>>, %arg2: memref<128x128xf32, #tpu.memory_space<vmem>>, %arg3: memref<1x128xf32, #tpu.memory_space<vmem>>, %arg4: memref<48x128xf32, #tpu.memory_space<vmem>>) attributes {dimension_semantics = [#tpu.dimension_semantics<parallel>], iteration_bounds = array<i64: 1>, scalar_prefetch = 0 : i64, scratch_operands = 0 : i64, tpu.core_type = #tpu.core_type<tc>, window_params = [{transform_indices = @transform_0, window_bounds = array<i64: 48, 128>}, {pipeline_mode = #tpu.pipeline_mode<synchronous>, transform_indices = @transform_1, window_bounds = array<i64: 128, 128>}, {pipeline_mode = #tpu.pipeline_mode<synchronous>, transform_indices = @transform_2, window_bounds = array<i64: 1, 128>}, {transform_indices = @transform_3, window_bounds = array<i64: 48, 128>}]} {
    %c0 = arith.constant 0 : index
    %c0_0 = arith.constant 0 : index
    %0 = vector.load %arg1[%c0, %c0_0] : memref<48x128xf32, #tpu.memory_space<vmem>>, vector<48x128xf32>
    %c0_1 = arith.constant 0 : index
    %c0_2 = arith.constant 0 : index
    %1 = vector.load %arg2[%c0_1, %c0_2] : memref<128x128xf32, #tpu.memory_space<vmem>>, vector<128x128xf32>
    %cst = arith.constant dense<0.000000e+00> : vector<48x128xf32>
    %2 = tpu.matmul %0, %1, %cst {dimension_numbers = #tpu.dot_dimension_numbers<[1], [0], [0], [1], [0, 0, 1, 1], [], []>} : vector<48x128xf32>, vector<128x128xf32>, vector<48x128xf32> -> vector<48x128xf32>
    %c0_3 = arith.constant 0 : index
    %c0_4 = arith.constant 0 : index
    %3 = vector.load %arg3[%c0_3, %c0_4] : memref<1x128xf32, #tpu.memory_space<vmem>>, vector<1x128xf32>
    %4 = vector.broadcast %3 : vector<1x128xf32> to vector<48x128xf32>
    %5 = arith.addf %2, %4 : vector<48x128xf32>
    %cst_5 = arith.constant 0.000000e+00 : f32
    %6 = vector.broadcast %cst_5 : f32 to vector<48x128xf32>
    %7 = arith.maximumf %5, %6 : vector<48x128xf32>
    %c0_6 = arith.constant 0 : index
    %c0_7 = arith.constant 0 : index
    %8 = vector.load %arg1[%c0_6, %c0_7] : memref<48x128xf32, #tpu.memory_space<vmem>>, vector<48x128xf32>
    %9 = arith.addf %7, %8 : vector<48x128xf32>
    %c0_8 = arith.constant 0 : index
    %c0_9 = arith.constant 0 : index
    %10 = vector.load %arg4[%c0_8, %c0_9] : memref<48x128xf32, #tpu.memory_space<vmem>>, vector<48x128xf32>
    tpu.vector_store %arg4[%c0_8, %c0_9], %9 {strides = array<i32>} : memref<48x128xf32, #tpu.memory_space<vmem>>, vector<48x128xf32>,
    return
  }
  func.func @transform_0(%arg0: i32) -> (i32, i32) {
    %c0_i32 = arith.constant 0 : i32
    %c0_i32_0 = arith.constant 0 : i32
    return %arg0, %c0_i32 : i32, i32
  }
  func.func @transform_1(%arg0: i32) -> (i32, i32) {
    %c0_i32 = arith.constant 0 : i32
    %c0_i32_0 = arith.constant 0 : i32
    %c0_i32_1 = arith.constant 0 : i32
    return %c0_i32, %c0_i32_0 : i32, i32
  }
  func.func @transform_2(%arg0: i32) -> (i32, i32) {
    %c0_i32 = arith.constant 0 : i32
    %c0_i32_0 = arith.constant 0 : i32
    %c0_i32_1 = arith.constant 0 : i32
    return %c0_i32, %c0_i32_0 : i32, i32
  }
  func.func @transform_3(%arg0: i32) -> (i32, i32) {
    %c0_i32 = arith.constant 0 : i32
    %c0_i32_0 = arith.constant 0 : i32
    return %arg0, %c0_i32 : i32, i32
  }
}

</mosaic_0001>

<bundles_post_ra>
// kernel: tpu_custom_call.1
= control target key start
LH: loop header
LB: loop body
LE: loop exit
PB: predicated region body
PF: predicated region fallthrough
CT: control target
= control target key end

     0   :  { %8 = vsyncpa [#allocation3], 0  ;;  %s416_s0 = inlined_call_operand.hbm [shape: f32[45,128], index: 0, kind: input, shape index: {}]   ;;  %s417_s1 = inlined_call_operand.hbm [shape: f32[128,128], index: 1, kind: input, shape index: {}]   ;;  %s418_s2 = inlined_call_operand.vmem [shape: f32[1,128], index: 2, kind: input, shape index: {}]   ;;  %s419_s3 = inlined_call_operand.hbm [shape: f32[45,128], index: 3, kind: output, shape index: {}]  }
   0x1   :  { %9 = vsyncpa [#allocation6], 0 }
   0x2   :  { %10 = vsyncpa [#allocation4], 0  ;;  %s370_s12 = smov [#allocation2]  }
   0x3   :  { %s16_s13 = sshll.u32 %s370_s12, 4  ;;  %s17_s13 = int_to_ptr.vmem [resolvable:$true] %s16_s13 }
   0x4   :  { %s312_s14 = scalar_lea.vmem %s17_s13, 768  ;;  %p317_p1 = scmp.lt.s32.totalorder %s17_s13, %s17_s13 }
   0x5   :  { %p313_p0 = scmp.ne.s32.totalorder %s17_s13, %s312_s14  ;;  %p318_p2 = scmp.lt.s32.totalorder %s312_s14, %s312_s14 }
   0x7   :  { %p319_p3 = por %p318_p2, %p317_p1 }
   0x9   :  { %p320_p4 = pnand %p319_p3, %p313_p0 }
   0xb   :  { %323 = shalt.err (!%p320_p4)
}
   0xc   :  { %s371_s15 = smov 128   ;;  %s372_s16 = smov 8  }
   0xd   :  { %22 = dma.hbm_to_vmem [thread:$0]  %s416_s0, 768, %s17_s13, [#allocation3], %s371_s15, %s371_s15, %s372_s16  }
   0xe   :  { %s373_s19 = smov [#allocation5]  }
   0xf   :  { %s28_s20 = sshll.u32 %s373_s19, 4  ;;  %s29_s20 = int_to_ptr.vmem [resolvable:$true] %s28_s20 }
  0x10   :  { %s332_s21 = scalar_lea.vmem %s29_s20, 2048  ;;  %p337_p6 = scmp.lt.s32.totalorder %s29_s20, %s29_s20 }
  0x11   :  { %p333_p5 = scmp.ne.s32.totalorder %s29_s20, %s332_s21  ;;  %p338_p7 = scmp.lt.s32.totalorder %s332_s21, %s332_s21 }
  0x13   :  { %p339_p8 = por %p338_p7, %p337_p6 }
  0x15   :  { %p340_p9 = pnand %p339_p8, %p333_p5 }
  0x17   :  { %343 = shalt.err (!%p340_p9)
}
  0x18   :  { %34 = dma.hbm_to_vmem [thread:$0]  %s417_s1, 2048, %s29_s20, [#allocation6], %s371_s15, %s371_s15, %s372_s16  }
  0x19   :  { %364 = dma.done.wait [#allocation3], 768  }
  0x1a   :  { %365 = vsyncadd [#allocation3], 4294966528 }
  0x1b   :  { %366 = dma.done.wait [#allocation6], 2048  }
  0x1c   :  { %367 = vsyncadd [#allocation6], 4294965248  ;;  %v64_v0 = vld [vmem:[#allocation5 + $0x78] sm:$0xff]  ;;  %v63_v1 = vld [vmem:[#allocation5 + $0x70] sm:$0xff] }
  0x1d   :  { %267 = vmatprep.subr.mxu1 %v64_v0  ;;  %226 = vmatprep.subr.mxu0 %v64_v0  ;;  %v62_v2 = vld [vmem:[#allocation5 + $0x68] sm:$0xff]  ;;  %v61_v3 = vld [vmem:[#allocation5 + $0x60] sm:$0xff]  ;;  %v60_v4 = vld [vmem:[#allocation5 + $0x58] sm:$0xff] }
  0x1e   :  { %283 = vmatpush3.msra.mxu1 %v64_v0  ;;  %227 = vmatpush3.msra.mxu0 %v64_v0  ;;  %v59_v5 = vld [vmem:[#allocation5 + $0x50] sm:$0xff]  ;;  %v58_v6 = vld [vmem:[#allocation5 + $0x48] sm:$0xff]  ;;  %v57_v7 = vld [vmem:[#allocation5 + $0x40] sm:$0xff] }
  0x1f   :  { %268 = vmatprep.subr.mxu1 %v63_v1  ;;  %228 = vmatprep.subr.mxu0 %v63_v1  ;;  %v56_v8 = vld [vmem:[#allocation5 + $0x38] sm:$0xff]  ;;  %v55_v9 = vld [vmem:[#allocation5 + $0x30] sm:$0xff]  ;;  %v54_v10 = vld [vmem:[#allocation5 + $0x28] sm:$0xff] }
  0x20   :  { %284 = vmatpush3.msra.mxu1 %v63_v1  ;;  %229 = vmatpush3.msra.mxu0 %v63_v1  ;;  %v53_v11 = vld [vmem:[#allocation5 + $0x20] sm:$0xff]  ;;  %v52_v12 = vld [vmem:[#allocation5 + $0x18] sm:$0xff]  ;;  %v51_v13 = vld [vmem:[#allocation5 + $0x10] sm:$0xff] }
  0x21   :  { %269 = vmatprep.subr.mxu1 %v62_v2  ;;  %230 = vmatprep.subr.mxu0 %v62_v2  ;;  %v50_v14 = vld [vmem:[#allocation5 + $0x8] sm:$0xff]  ;;  %v49_v15 = vld [vmem:[#allocation5] sm:$0xff]  ;;  %v43_v18 = vld [vmem:[#allocation2] sm:$0xff] }
  0x22   :  { %285 = vmatpush3.msra.mxu1 %v62_v2  ;;  %231 = vmatpush3.msra.mxu0 %v62_v2  ;;  %v45_v16 = vld [vmem:[#allocation2 + $0x10] sm:$0xff]  ;;  %v46_v17 = vld [vmem:[#allocation2 + $0x18] sm:$0xff]  ;;  %v47_v19 = vld [vmem:[#allocation2 + $0x20] sm:$0xff] }
  0x23   :  { %270 = vmatprep.subr.mxu1 %v61_v3  ;;  %232 = vmatprep.subr.mxu0 %v61_v3  ;;  %v44_v20 = vld [vmem:[#allocation2 + $0x8] sm:$0xff]  ;;  %v203_v22 = vld [vmem:[%s418_s2] ss:$0 sm:$0xff]  ;;  %s374_s2 = smov [#allocation7]  }
  0x24   :  { %286 = vmatpush3.msra.mxu1 %v61_v3  ;;  %233 = vmatpush3.msra.mxu0 %v61_v3  ;;  %v48_v21 = vld [vmem:[#allocation2 + $0x28] sm:$0xff]  ;;  %s190_s24 = sshll.u32 %s374_s2, 4  ;;  %s191_s24 = int_to_ptr.vmem [resolvable:$true] %s190_s24 }
  0x25   :  { %271 = vmatprep.subr.mxu1 %v60_v4  ;;  %234 = vmatprep.subr.mxu0 %v60_v4  ;;  %s344_s25 = scalar_lea.vmem %s191_s24, 768  ;;  %p349_p11 = scmp.lt.s32.totalorder %s191_s24, %s191_s24 }
  0x26   :  { %287 = vmatpush3.msra.mxu1 %v60_v4  ;;  %235 = vmatpush3.msra.mxu0 %v60_v4  ;;  %p345_p10 = scmp.ne.s32.totalorder %s191_s24, %s344_s25  ;;  %p350_p12 = scmp.lt.s32.totalorder %s344_s25, %s344_s25 }
  0x27   :  { %272 = vmatprep.subr.mxu1 %v59_v5  ;;  %236 = vmatprep.subr.mxu0 %v59_v5 }
  0x28   :  { %288 = vmatpush3.msra.mxu1 %v59_v5  ;;  %237 = vmatpush3.msra.mxu0 %v59_v5  ;;  %p351_p13 = por %p350_p12, %p349_p11 }
  0x29   :  { %273 = vmatprep.subr.mxu1 %v58_v6  ;;  %238 = vmatprep.subr.mxu0 %v58_v6 }
  0x2a   :  { %289 = vmatpush3.msra.mxu1 %v58_v6  ;;  %239 = vmatpush3.msra.mxu0 %v58_v6  ;;  %p352_p0 = pnand %p351_p13, %p345_p10 }
  0x2b   :  { %274 = vmatprep.subr.mxu1 %v57_v7  ;;  %240 = vmatprep.subr.mxu0 %v57_v7 }
  0x2c   :  { %290 = vmatpush3.msra.mxu1 %v57_v7  ;;  %241 = vmatpush3.msra.mxu0 %v57_v7 }
  0x2d   :  { %275 = vmatprep.subr.mxu1 %v56_v8  ;;  %242 = vmatprep.subr.mxu0 %v56_v8 }
  0x2e   :  { %291 = vmatpush3.msra.mxu1 %v56_v8  ;;  %243 = vmatpush3.msra.mxu0 %v56_v8 }
  0x2f   :  { %276 = vmatprep.subr.mxu1 %v55_v9  ;;  %244 = vmatprep.subr.mxu0 %v55_v9 }
  0x30   :  { %292 = vmatpush3.msra.mxu1 %v55_v9  ;;  %245 = vmatpush3.msra.mxu0 %v55_v9 }
  0x31   :  { %277 = vmatprep.subr.mxu1 %v54_v10  ;;  %246 = vmatprep.subr.mxu0 %v54_v10 }
  0x32   :  { %293 = vmatpush3.msra.mxu1 %v54_v10  ;;  %247 = vmatpush3.msra.mxu0 %v54_v10 }
  0x33   :  { %278 = vmatprep.subr.mxu1 %v53_v11  ;;  %248 = vmatprep.subr.mxu0 %v53_v11 }
  0x34   :  { %294 = vmatpush3.msra.mxu1 %v53_v11  ;;  %249 = vmatpush3.msra.mxu0 %v53_v11 }
  0x35   :  { %279 = vmatprep.subr.mxu1 %v52_v12  ;;  %250 = vmatprep.subr.mxu0 %v52_v12 }
  0x36   :  { %295 = vmatpush3.msra.mxu1 %v52_v12  ;;  %251 = vmatpush3.msra.mxu0 %v52_v12 }
  0x37   :  { %280 = vmatprep.subr.mxu1 %v51_v13  ;;  %252 = vmatprep.subr.mxu0 %v51_v13 }
  0x38   :  { %296 = vmatpush3.msra.mxu1 %v51_v13  ;;  %253 = vmatpush3.msra.mxu0 %v51_v13 }
  0x39   :  { %281 = vmatprep.subr.mxu1 %v50_v14  ;;  %254 = vmatprep.subr.mxu0 %v50_v14 }
  0x3a   :  { %297 = vmatpush3.msra.mxu1 %v50_v14  ;;  %255 = vmatpush3.msra.mxu0 %v50_v14 }
  0x3b   :  { %282 = vmatprep.subr.mxu1 %v49_v15  ;;  %261 = vmatprep.mubr.f32.mxu1 %v45_v16 }
  0x3c   :  { %298 = vmatpush3.msra.mxu1 %v49_v15  ;;  %256 = vmatprep.subr.mxu0 %v49_v15 }
  0x3d   :  { %262 = vmatmul.mubr.f32.vlgmr.msra.gmra.mxu1 %v46_v17  ;;  %257 = vmatpush3.msra.mxu0 %v49_v15 }
  0x3e   :  { %258 = vmatprep.mubr.f32.mxu0 %v43_v18  ;;  %264 = vmatprep.mubr.f32.mxu1 %v47_v19 }
  0x3f   :  { %259 = vmatmul.mubr.f32.vlgmr.msra.gmra.mxu0 %v44_v20 }
  0x41   :  { %265 = vmatmul.mubr.f32.gmra.mxu1 %v48_v21 }
  0xfd   :  { %v263_v23 = vpop.f32.mrf.mxu1 }
  0xfe   :  { %v154_v24 = vadd.f32 %v263_v23, %v203_v22 }
  0xff   :  { %v260_v25 = vpop.f32.mrf.mxu0  ;;  %v148_v26 = vpop.f32.mrf.mxu1 }
 0x100   :  { %v170_v27 = vmax.f32 %v154_v24, 0.0  ;;  %v144_v28 = vadd.f32 %v260_v25, %v203_v22  ;;  %v149_v29 = vadd.f32 %v203_v22, %v148_v26 }
 0x101   :  { %v138_v30 = vpop.f32.mrf.mxu0  ;;  %v266_v31 = vpop.f32.mrf.mxu1 }
 0x102   :  { %v176_v32 = vadd.f32 %v170_v27, %v46_v17  ;;  %v168_v33 = vmax.f32 %v144_v28, 0.0  ;;  %v169_v34 = vmax.f32 %v149_v29, 0.0  ;;  %v139_v35 = vadd.f32 %v203_v22, %v138_v30 }
 0x103   :  { %v164_v36 = vadd.f32 %v266_v31, %v203_v22  ;;  %v158_v37 = vpop.f32.mrf.mxu1 }
 0x104   :  { %182 = vst [vmem:[#allocation7 + $0x18] sm:$0xff] %v176_v32  ;;  %v174_v38 = vadd.f32 %v168_v33, %v44_v20  ;;  %v175_v39 = vadd.f32 %v169_v34, %v45_v16  ;;  %v167_v40 = vmax.f32 %v139_v35, 0.0  ;;  %v159_v41 = vadd.f32 %v203_v22, %v158_v37 }
 0x105   :  { %v172_v42 = vmax.f32 %v164_v36, 0.0 }
 0x106   :  { %180 = vst [vmem:[#allocation7 + $0x8] sm:$0xff] %v174_v38  ;;  %181 = vst [vmem:[#allocation7 + $0x10] sm:$0xff] %v175_v39  ;;  %v173_v43 = vadd.f32 %v167_v40, %v43_v18  ;;  %v171_v44 = vmax.f32 %v159_v41, 0.0 }
 0x107   :  { %v178_v45 = vadd.f32 %v172_v42, %v48_v21 }
 0x108   :  { %179 = vst [vmem:[#allocation7] sm:$0xff] %v173_v43  ;;  %v177_v46 = vadd.f32 %v171_v44, %v47_v19 }
 0x109   :  { %184 = vst [vmem:[#allocation7 + $0x28] sm:$0xff] %v178_v45 }
 0x10a   :  { %183 = vst [vmem:[#allocation7 + $0x20] sm:$0xff] %v177_v46 }
 0x10b   :  { %355 = shalt.err (!%p352_p0)
}
 0x10c   :  { %196 = dma.vmem_to_hbm [thread:$0]  %s191_s24, 768, %s419_s3, [#allocation4], %s371_s15, %s371_s15, %s372_s16  }
 0x10d   :  { %368 = dma.done.wait [#allocation4], 768  }
 0x10e   :  { %369 = vsyncadd [#allocation4], 4294966528 }
 0x10f   :  { %200 = vsyncpa [#allocation3], 1 }
 0x110   :  { %201 = vsyncpa [#allocation6], 1 }
 0x111   :  { %202 = vsyncpa [#allocation4], 1 }

// kernel: tpu_custom_call.1
= control target key start
LH: loop header
LB: loop body
LE: loop exit
PB: predicated region body
PF: predicated region fallthrough
CT: control target
= control target key end

     0   :  { %8 = vsyncpa [#allocation3], 0  ;;  %s416_s0 = inlined_call_operand.hbm [shape: f32[45,128], index: 0, kind: input, shape index: {}]   ;;  %s417_s1 = inlined_call_operand.hbm [shape: f32[128,128], index: 1, kind: input, shape index: {}]   ;;  %s418_s2 = inlined_call_operand.vmem [shape: f32[1,128], index: 2, kind: input, shape index: {}]   ;;  %s419_s3 = inlined_call_operand.hbm [shape: f32[45,128], index: 3, kind: output, shape index: {}]  }
   0x1   :  { %9 = vsyncpa [#allocation6], 0 }
   0x2   :  { %10 = vsyncpa [#allocation4], 0  ;;  %s370_s12 = smov [#allocation2]  }
   0x3   :  { %s16_s13 = sshll.u32 %s370_s12, 4  ;;  %s17_s13 = int_to_ptr.vmem [resolvable:$true] %s16_s13 }
   0x4   :  { %s312_s14 = scalar_lea.vmem %s17_s13, 768  ;;  %p317_p1 = scmp.lt.s32.totalorder %s17_s13, %s17_s13 }
   0x5   :  { %p313_p0 = scmp.ne.s32.totalorder %s17_s13, %s312_s14  ;;  %p318_p2 = scmp.lt.s32.totalorder %s312_s14, %s312_s14 }
   0x7   :  { %p319_p3 = por %p318_p2, %p317_p1 }
   0x9   :  { %p320_p4 = pnand %p319_p3, %p313_p0 }
   0xb   :  { %323 = shalt.err (!%p320_p4)
}
   0xc   :  { %s371_s15 = smov 128   ;;  %s372_s16 = smov 8  }
   0xd   :  { %22 = dma.hbm_to_vmem [thread:$0]  %s416_s0, 768, %s17_s13, [#allocation3], %s371_s15, %s371_s15, %s372_s16  }
   0xe   :  { %s373_s19 = smov [#allocation5]  }
   0xf   :  { %s28_s20 = sshll.u32 %s373_s19, 4  ;;  %s29_s20 = int_to_ptr.vmem [resolvable:$true] %s28_s20 }
  0x10   :  { %s332_s21 = scalar_lea.vmem %s29_s20, 2048  ;;  %p337_p6 = scmp.lt.s32.totalorder %s29_s20, %s29_s20 }
  0x11   :  { %p333_p5 = scmp.ne.s32.totalorder %s29_s20, %s332_s21  ;;  %p338_p7 = scmp.lt.s32.totalorder %s332_s21, %s332_s21 }
  0x13   :  { %p339_p8 = por %p338_p7, %p337_p6 }
  0x15   :  { %p340_p9 = pnand %p339_p8, %p333_p5 }
  0x17   :  { %343 = shalt.err (!%p340_p9)
}
  0x18   :  { %34 = dma.hbm_to_vmem [thread:$0]  %s417_s1, 2048, %s29_s20, [#allocation6], %s371_s15, %s371_s15, %s372_s16  }
  0x19   :  { %364 = dma.done.wait [#allocation3], 768  }
  0x1a   :  { %365 = vsyncadd [#allocation3], 4294966528 }
  0x1b   :  { %366 = dma.done.wait [#allocation6], 2048  }
  0x1c   :  { %367 = vsyncadd [#allocation6], 4294965248  ;;  %v64_v0 = vld [vmem:[#allocation5 + $0x78] sm:$0xff]  ;;  %v63_v1 = vld [vmem:[#allocation5 + $0x70] sm:$0xff] }
  0x1d   :  { %267 = vmatprep.subr.mxu1 %v64_v0  ;;  %226 = vmatprep.subr.mxu0 %v64_v0  ;;  %v62_v2 = vld [vmem:[#allocation5 + $0x68] sm:$0xff]  ;;  %v61_v3 = vld [vmem:[#allocation5 + $0x60] sm:$0xff]  ;;  %v60_v4 = vld [vmem:[#allocation5 + $0x58] sm:$0xff] }
  0x1e   :  { %283 = vmatpush3.msra.mxu1 %v64_v0  ;;  %227 = vmatpush3.msra.mxu0 %v64_v0  ;;  %v59_v5 = vld [vmem:[#allocation5 + $0x50] sm:$0xff]  ;;  %v58_v6 = vld [vmem:[#allocation5 + $0x48] sm:$0xff]  ;;  %v57_v7 = vld [vmem:[#allocation5 + $0x40] sm:$0xff] }
  0x1f   :  { %268 = vmatprep.subr.mxu1 %v63_v1  ;;  %228 = vmatprep.subr.mxu0 %v63_v1  ;;  %v56_v8 = vld [vmem:[#allocation5 + $0x38] sm:$0xff]  ;;  %v55_v9 = vld [vmem:[#allocation5 + $0x30] sm:$0xff]  ;;  %v54_v10 = vld [vmem:[#allocation5 + $0x28] sm:$0xff] }
  0x20   :  { %284 = vmatpush3.msra.mxu1 %v63_v1  ;;  %229 = vmatpush3.msra.mxu0 %v63_v1  ;;  %v53_v11 = vld [vmem:[#allocation5 + $0x20] sm:$0xff]  ;;  %v52_v12 = vld [vmem:[#allocation5 + $0x18] sm:$0xff]  ;;  %v51_v13 = vld [vmem:[#allocation5 + $0x10] sm:$0xff] }
  0x21   :  { %269 = vmatprep.subr.mxu1 %v62_v2  ;;  %230 = vmatprep.subr.mxu0 %v62_v2  ;;  %v50_v14 = vld [vmem:[#allocation5 + $0x8] sm:$0xff]  ;;  %v49_v15 = vld [vmem:[#allocation5] sm:$0xff]  ;;  %v43_v18 = vld [vmem:[#allocation2] sm:$0xff] }
  0x22   :  { %285 = vmatpush3.msra.mxu1 %v62_v2  ;;  %231 = vmatpush3.msra.mxu0 %v62_v2  ;;  %v45_v16 = vld [vmem:[#allocation2 + $0x10] sm:$0xff]  ;;  %v46_v17 = vld [vmem:[#allocation2 + $0x18] sm:$0xff]  ;;  %v47_v19 = vld [vmem:[#allocation2 + $0x20] sm:$0xff] }
  0x23   :  { %270 = vmatprep.subr.mxu1 %v61_v3  ;;  %232 = vmatprep.subr.mxu0 %v61_v3  ;;  %v44_v20 = vld [vmem:[#allocation2 + $0x8] sm:$0xff]  ;;  %v203_v22 = vld [vmem:[%s418_s2] ss:$0 sm:$0xff]  ;;  %s374_s2 = smov [#allocation7]  }
  0x24   :  { %286 = vmatpush3.msra.mxu1 %v61_v3  ;;  %233 = vmatpush3.msra.mxu0 %v61_v3  ;;  %v48_v21 = vld [vmem:[#allocation2 + $0x28] sm:$0xff]  ;;  %s190_s24 = sshll.u32 %s374_s2, 4  ;;  %s191_s24 = int_to_ptr.vmem [resolvable:$true] %s190_s24 }
  0x25   :  { %271 = vmatprep.subr.mxu1 %v60_v4  ;;  %234 = vmatprep.subr.mxu0 %v60_v4  ;;  %s344_s25 = scalar_lea.vmem %s191_s24, 768  ;;  %p349_p11 = scmp.lt.s32.totalorder %s191_s24, %s191_s24 }
  0x26   :  { %287 = vmatpush3.msra.mxu1 %v60_v4  ;;  %235 = vmatpush3.msra.mxu0 %v60_v4  ;;  %p345_p10 = scmp.ne.s32.totalorder %s191_s24, %s344_s25  ;;  %p350_p12 = scmp.lt.s32.totalorder %s344_s25, %s344_s25 }
  0x27   :  { %272 = vmatprep.subr.mxu1 %v59_v5  ;;  %236 = vmatprep.subr.mxu0 %v59_v5 }
  0x28   :  { %288 = vmatpush3.msra.mxu1 %v59_v5  ;;  %237 = vmatpush3.msra.mxu0 %v59_v5  ;;  %p351_p13 = por %p350_p12, %p349_p11 }
  0x29   :  { %273 = vmatprep.subr.mxu1 %v58_v6  ;;  %238 = vmatprep.subr.mxu0 %v58_v6 }
  0x2a   :  { %289 = vmatpush3.msra.mxu1 %v58_v6  ;;  %239 = vmatpush3.msra.mxu0 %v58_v6  ;;  %p352_p0 = pnand %p351_p13, %p345_p10 }
  0x2b   :  { %274 = vmatprep.subr.mxu1 %v57_v7  ;;  %240 = vmatprep.subr.mxu0 %v57_v7 }
  0x2c   :  { %290 = vmatpush3.msra.mxu1 %v57_v7  ;;  %241 = vmatpush3.msra.mxu0 %v57_v7 }
  0x2d   :  { %275 = vmatprep.subr.mxu1 %v56_v8  ;;  %242 = vmatprep.subr.mxu0 %v56_v8 }
  0x2e   :  { %291 = vmatpush3.msra.mxu1 %v56_v8  ;;  %243 = vmatpush3.msra.mxu0 %v56_v8 }
  0x2f   :  { %276 = vmatprep.subr.mxu1 %v55_v9  ;;  %244 = vmatprep.subr.mxu0 %v55_v9 }
  0x30   :  { %292 = vmatpush3.msra.mxu1 %v55_v9  ;;  %245 = vmatpush3.msra.mxu0 %v55_v9 }
  0x31   :  { %277 = vmatprep.subr.mxu1 %v54_v10  ;;  %246 = vmatprep.subr.mxu0 %v54_v10 }
  0x32   :  { %293 = vmatpush3.msra.mxu1 %v54_v10  ;;  %247 = vmatpush3.msra.mxu0 %v54_v10 }
  0x33   :  { %278 = vmatprep.subr.mxu1 %v53_v11  ;;  %248 = vmatprep.subr.mxu0 %v53_v11 }
  0x34   :  { %294 = vmatpush3.msra.mxu1 %v53_v11  ;;  %249 = vmatpush3.msra.mxu0 %v53_v11 }
  0x35   :  { %279 = vmatprep.subr.mxu1 %v52_v12  ;;  %250 = vmatprep.subr.mxu0 %v52_v12 }
  0x36   :  { %295 = vmatpush3.msra.mxu1 %v52_v12  ;;  %251 = vmatpush3.msra.mxu0 %v52_v12 }
  0x37   :  { %280 = vmatprep.subr.mxu1 %v51_v13  ;;  %252 = vmatprep.subr.mxu0 %v51_v13 }
  0x38   :  { %296 = vmatpush3.msra.mxu1 %v51_v13  ;;  %253 = vmatpush3.msra.mxu0 %v51_v13 }
  0x39   :  { %281 = vmatprep.subr.mxu1 %v50_v14  ;;  %254 = vmatprep.subr.mxu0 %v50_v14 }
  0x3a   :  { %297 = vmatpush3.msra.mxu1 %v50_v14  ;;  %255 = vmatpush3.msra.mxu0 %v50_v14 }
  0x3b   :  { %282 = vmatprep.subr.mxu1 %v49_v15  ;;  %261 = vmatprep.mubr.f32.mxu1 %v45_v16 }
  0x3c   :  { %298 = vmatpush3.msra.mxu1 %v49_v15  ;;  %256 = vmatprep.subr.mxu0 %v49_v15 }
  0x3d   :  { %262 = vmatmul.mubr.f32.vlgmr.msra.gmra.mxu1 %v46_v17  ;;  %257 = vmatpush3.msra.mxu0 %v49_v15 }
  0x3e   :  { %258 = vmatprep.mubr.f32.mxu0 %v43_v18  ;;  %264 = vmatprep.mubr.f32.mxu1 %v47_v19 }
  0x3f   :  { %259 = vmatmul.mubr.f32.vlgmr.msra.gmra.mxu0 %v44_v20 }
  0x41   :  { %265 = vmatmul.mubr.f32.gmra.mxu1 %v48_v21 }
  0xfd   :  { %v263_v23 = vpop.f32.mrf.mxu1 }
  0xfe   :  { %v154_v24 = vadd.f32 %v263_v23, %v203_v22 }
  0xff   :  { %v260_v25 = vpop.f32.mrf.mxu0  ;;  %v148_v26 = vpop.f32.mrf.mxu1 }
 0x100   :  { %v170_v27 = vmax.f32 %v154_v24, 0.0  ;;  %v144_v28 = vadd.f32 %v260_v25, %v203_v22  ;;  %v149_v29 = vadd.f32 %v203_v22, %v148_v26 }
 0x101   :  { %v138_v30 = vpop.f32.mrf.mxu0  ;;  %v266_v31 = vpop.f32.mrf.mxu1 }
 0x102   :  { %v176_v32 = vadd.f32 %v170_v27, %v46_v17  ;;  %v168_v33 = vmax.f32 %v144_v28, 0.0  ;;  %v169_v34 = vmax.f32 %v149_v29, 0.0  ;;  %v139_v35 = vadd.f32 %v203_v22, %v138_v30 }
 0x103   :  { %v164_v36 = vadd.f32 %v266_v31, %v203_v22  ;;  %v158_v37 = vpop.f32.mrf.mxu1 }
 0x104   :  { %182 = vst [vmem:[#allocation7 + $0x18] sm:$0xff] %v176_v32  ;;  %v174_v38 = vadd.f32 %v168_v33, %v44_v20  ;;  %v175_v39 = vadd.f32 %v169_v34, %v45_v16  ;;  %v167_v40 = vmax.f32 %v139_v35, 0.0  ;;  %v159_v41 = vadd.f32 %v203_v22, %v158_v37 }
 0x105   :  { %v172_v42 = vmax.f32 %v164_v36, 0.0 }
 0x106   :  { %180 = vst [vmem:[#allocation7 + $0x8] sm:$0xff] %v174_v38  ;;  %181 = vst [vmem:[#allocation7 + $0x10] sm:$0xff] %v175_v39  ;;  %v173_v43 = vadd.f32 %v167_v40, %v43_v18  ;;  %v171_v44 = vmax.f32 %v159_v41, 0.0 }
 0x107   :  { %v178_v45 = vadd.f32 %v172_v42, %v48_v21 }
 0x108   :  { %179 = vst [vmem:[#allocation7] sm:$0xff] %v173_v43  ;;  %v177_v46 = vadd.f32 %v171_v44, %v47_v19 }
 0x109   :  { %184 = vst [vmem:[#allocation7 + $0x28] sm:$0xff] %v178_v45 }
 0x10a   :  { %183 = vst [vmem:[#allocation7 + $0x20] sm:$0xff] %v177_v46 }
 0x10b   :  { %355 = shalt.err (!%p352_p0)
}
 0x10c   :  { %196 = dma.vmem_to_hbm [thread:$0]  %s191_s24, 768, %s419_s3, [#allocation4], %s371_s15, %s371_s15, %s372_s16  }
 0x10d   :  { %368 = dma.done.wait [#allocation4], 768  }
 0x10e   :  { %369 = vsyncadd [#allocation4], 4294966528 }
 0x10f   :  { %200 = vsyncpa [#allocation3], 1 }
 0x110   :  { %201 = vsyncpa [#allocation6], 1 }
 0x111   :  { %202 = vsyncpa [#allocation4], 1 }

</bundles_post_ra>
